<compile_context>
chip_gen: v6e
topology: v6e:2x2x1
jax: 0.10.0
libtpu: 0.0.40
codegen_flags: <defaults>
</compile_context>

<pallas_src>
import functools

import jax
import jax.numpy as jnp
from jax import lax
from jax.experimental import pallas as pl
from jax.experimental.pallas import tpu as pltpu


_CACHE_DTYPE = jnp.bfloat16  # storage dtype of the streamed history caches


# ---------------------------------------------------------------------------
# Kernel
# ---------------------------------------------------------------------------
def _intra_attn_kernel(len_ref, prev_s_ref, prev_proj_ref, dec_fea_ref, v_ref,
                       ct_ref):
    # len_ref:       (1,)  int32 (SMEM, scalar prefetch) -- valid history rows
    # prev_s_ref:    (bt, Tpad, H)  previous decoder states   (cache dtype)
    # prev_proj_ref: (bt, Tpad, H)  cached prev_s @ W_prev    (cache dtype)
    # dec_fea_ref:   (bt, H)        W_s(s_t) + b_s            (cache dtype)
    # v_ref:         (1, H)         scoring vector v          (cache dtype)
    # ct_ref:        (bt, H)        output context vector
    ps = prev_s_ref[...]                                   # (bt, Tpad, H)
    proj = prev_proj_ref[...]                              # (bt, Tpad, H)
    dec_fea = dec_fea_ref[...]                             # (bt, H)
    bt, t_pad, h = ps.shape

    # et = tanh(W_prev(prev_s) + W_s(s_t)); stays in the cache dtype
    # (bf16 VPU/EUP path on v6e/v7x; Mosaic upcasts internally on v5e).
    et = jnp.tanh(proj + dec_fea[:, None, :])              # (bt, Tpad, H)

    # scores[b, t] = et[b, t, :] . v  -- VPU multiply + f32 lane reduction
    # over H (no M=1 MXU matmul / transpose); T ends up on the lane axis.
    v = v_ref[...]                                         # (1, H)
    scores = jnp.sum((et * v[None, :, :]).astype(jnp.float32),
                     axis=-1)                              # (bt, Tpad) f32

    # Mask padded history rows (t >= length) before the softmax.
    t_idx = lax.broadcasted_iota(jnp.int32, (bt, t_pad), 1)
    scores = jnp.where(t_idx < len_ref[0], scores, jnp.float32(-1e30))

    # Softmax over the (lane-axis) history dimension.
    m = jnp.max(scores, axis=-1, keepdims=True)            # (bt, 1)
    e = jnp.exp(scores - m)                                 # (bt, Tpad)
    # Approx reciprocal -> EUP slot; ~1e-3-level change vs exact divide.
    at = e * pl.reciprocal(jnp.sum(e, axis=-1, keepdims=True), approx=True)

    # ct[b] = sum_t at[b, t] * prev_s[b, t, :]  -- batched (1,Tpad)@(Tpad,H)
    # MXU matmul, cache-dtype operands, f32 accumulation.  Padded rows carry
    # zero weight (and the caches are zero-initialized), so they contribute 0.
    ct = jnp.einsum('bqt,bth->bqh', at[:, None, :].astype(ps.dtype), ps,
                    preferred_element_type=jnp.float32)     # (bt, 1, H)
    ct_ref[...] = ct[:, 0, :].astype(ct_ref.dtype)


# ---------------------------------------------------------------------------
# Tiling / pallas_call wrapper
# ---------------------------------------------------------------------------
def _batch_tile(B, T, H, itemsize, budget_bytes=20 * 1024 * 1024):
    # Rough VMEM bytes held per batch row in one grid step:
    #   2 streamed (T,H) inputs x 2 pipeline buffers        -> 4*T*H*itemsize
    #   ~2 compute-dtype intermediates (et, masked product)  -> 2*T*H*itemsize
    #   f32 scores / softmax scratch + (H,) rows             -> (T + 4*H)*4
    # Budget is kept well under the explicit 32 MiB vmem_limit (and under the
    # ~24-32 MiB usable scoped VMEM on v7x's 64 MiB physical VMEM).
    # TODO(synk): for very long histories (even bt=8 exceeding the budget),
    # add a T grid axis with an online (flash-style) softmax accumulator.
    per_row = T * H * itemsize * 6 + (T + 4 * H) * 4
    bt = max(1, budget_bytes // per_row)
    if B >= 16:
        bt = min(bt, -(-B // 2))   # expose >=2 grid tiles for 2-TC chips (v7x)
    if bt >= B:
        return B                   # full-dim block: exempt from (8,128) rule
    return max(8, (bt // 8) * 8)   # sublane-aligned tile for the 2-D (bt,H) blocks


@functools.partial(jax.jit, static_argnames=("out_dtype",))
def _intra_attn_pallas(length, prev_s, prev_proj, dec_fea, v_row, *, out_dtype):
    B, t_pad, H = prev_s.shape
    bt = _batch_tile(B, t_pad, H, prev_s.dtype.itemsize)
    nb = pl.cdiv(B, bt)  # remainder batch blocks are masked by Pallas

    grid_spec = pltpu.PrefetchScalarGridSpec(
        num_scalar_prefetch=1,
        grid=(nb,),
        in_specs=[
            pl.BlockSpec((bt, t_pad, H), lambda b, ln: (b, 0, 0)),   # prev_s
            pl.BlockSpec((bt, t_pad, H), lambda b, ln: (b, 0, 0)),   # prev_proj
            pl.BlockSpec((bt, H),        lambda b, ln: (b, 0)),      # dec_fea
            pl.BlockSpec((1, H),         lambda b, ln: (0, 0)),      # v
        ],
        out_specs=pl.BlockSpec((bt, H), lambda b, ln: (b, 0)),
    )
    return pl.pallas_call(
        _intra_attn_kernel,
        out_shape=jax.ShapeDtypeStruct((B, H), out_dtype),
        grid_spec=grid_spec,
        compiler_params=pltpu.CompilerParams(
            # TODO(synk): consider pltpu.CORE_PARALLEL on v7x; plain
            # "parallel" vs "arbitrary" has near-zero measured effect.
            dimension_semantics=("parallel",),
            vmem_limit_bytes=32 * 1024 * 1024),
    )(length, prev_s, prev_proj, dec_fea, v_row)


# ---------------------------------------------------------------------------
# Module-level wrappers
# ---------------------------------------------------------------------------
def init_decoder_attention_state(batch, hidden, max_steps,
                                 cache_dtype=_CACHE_DTYPE):
    """Preallocated fixed-shape history caches (no per-step recompiles)."""
    return {
        "prev_s": jnp.zeros((batch, max_steps, hidden), cache_dtype),
        "prev_proj": jnp.zeros((batch, max_steps, hidden), cache_dtype),
        "length": jnp.zeros((1,), jnp.int32),
    }


@jax.jit
def decoder_attention_step(s_t, state, params):
    """Steady-state decode step: (ct_d, new_state); fixed shapes throughout.

    Caller must ensure the number of steps never exceeds the cache's max_T.
    With length == 0 the kernel's masked softmax over the zero-initialized
    cache yields ct_d == 0, matching the PyTorch `prev_s is None` branch.
    """
    cache_dtype = state["prev_s"].dtype
    length = state["length"]

    # dec_fea = W_s(s_t) + b_s : one (B,H)@(H,H) matmul for the whole batch.
    dec_fea = (s_t @ params["W_s"] + params["b_s"]).astype(cache_dtype)
    v_row = params["v"].astype(cache_dtype)
    ct_d = _intra_attn_pallas(length, state["prev_s"], state["prev_proj"],
                              dec_fea, v_row, out_dtype=s_t.dtype)

    # Append s_t (and its W_prev projection) in place: one (B,1,H) row write
    # per step instead of copying the whole history.
    idx = length[0]
    proj_t = (s_t @ params["W_prev"]).astype(cache_dtype)
    new_state = {
        "prev_s": lax.dynamic_update_slice(
            state["prev_s"], s_t.astype(cache_dtype)[:, None, :], (0, idx, 0)),
        "prev_proj": lax.dynamic_update_slice(
            state["prev_proj"], proj_t[:, None, :], (0, idx, 0)),
        "length": length + 1,
    }
    return ct_d, new_state


def decoder_attention_forward(s_t, prev_s, params, intra_decoder=True,
                              cache_dtype=_CACHE_DTYPE):
    """PyTorch-compatible forward: returns (ct_d, new_prev_s).

    Stateless path: pads the history to a 128-bucket (so consecutive decode
    steps reuse the same compiled kernel) and masks via the prefetched length.
    Steady-state decode should prefer `decoder_attention_step`, which never
    re-projects or copies the history.
    """
    if not intra_decoder:
        return jnp.zeros_like(s_t), prev_s
    if prev_s is None:
        return jnp.zeros_like(s_t), s_t[:, None, :]

    B, T, H = prev_s.shape
    t_pad = max(128, ((T + 127) // 128) * 128)          # bucketed padded length

    prev_proj = jnp.einsum('bth,hk->btk', prev_s, params["W_prev"])
    ps_pad = jnp.zeros((B, t_pad, H), cache_dtype).at[:, :T, :].set(
        prev_s.astype(cache_dtype))
    pp_pad = jnp.zeros((B, t_pad, H), cache_dtype).at[:, :T, :].set(
        prev_proj.astype(cache_dtype))
    dec_fea = (s_t @ params["W_s"] + params["b_s"]).astype(cache_dtype)
    v_row = params["v"].astype(cache_dtype)
    length = jnp.array([T], jnp.int32)

    ct_d = _intra_attn_pallas(length, ps_pad, pp_pad, dec_fea, v_row,
                              out_dtype=s_t.dtype)
    new_prev_s = jnp.concatenate([prev_s, s_t[:, None, :]], axis=1)
    return ct_d, new_prev_s


# ---------------------------------------------------------------------------
# Plain-JAX reference for verification
# ---------------------------------------------------------------------------
def _reference_forward(s_t, prev_s, params):
    et = prev_s @ params["W_prev"]                                   # (B,T,H)
    dec_fea = (s_t @ params["W_s"] + params["b_s"])[:, None, :]      # (B,1,H)
    et = jnp.tanh(et + dec_fea)
    scores = jnp.einsum('bth,h->bt', et, params["v"][0])             # (B,T)
    at = jax.nn.softmax(scores, axis=1)[:, None, :]                  # (B,1,T)
    return (at @ prev_s)[:, 0, :]                                    # (B,H)


if __name__ == "__main__":
    B, T, H = 2, 8, 32      # batch, previous decoder steps, hidden_dim
    MAX_T = 16              # preallocated cache length for the stateful path

    key = jax.random.PRNGKey(0)
    k1, k2, k3, k4, k5, k6, k7 = jax.random.split(key, 7)

    # Synthetic parameters (shapes implied by the module __init__), stored as
    # (in, out) so the wrappers compute x @ W directly.
    params = {
        "W_prev": jax.random.normal(k1, (H, H), jnp.float32) * 0.1,  # Linear(H,H,bias=False)
        "W_s":    jax.random.normal(k2, (H, H), jnp.float32) * 0.1,  # Linear(H,H) weight
        "b_s":    jax.random.normal(k3, (1, H), jnp.float32) * 0.1,  # Linear(H,H) bias
        "v":      jax.random.normal(k4, (1, H), jnp.float32) * 0.1,  # Linear(H,1,bias=False)
    }

    s_t = jax.random.normal(k5, (B, H), jnp.float32)
    prev_s = jax.random.normal(k6, (B, T, H), jnp.float32)
    s_t2 = jax.random.normal(k7, (B, H), jnp.float32)

    # Tolerance covers bf16 cache storage + pl.reciprocal(approx=True).
    TOL = dict(atol=3e-2, rtol=3e-2)

    # Branch: intra_decoder disabled.
    ct_off, ps_off = decoder_attention_forward(s_t, prev_s, params,
                                               intra_decoder=False)
    assert ct_off.shape == (B, H) and ps_off.shape == (B, T, H)

    # Branch: prev_s is None.
    ct_none, ps_none = decoder_attention_forward(s_t, None, params)
    assert ct_none.shape == (B, H) and ps_none.shape == (B, 1, H)

    # PyTorch-compatible stateless forward (padded + length-masked kernel).
    ct_d, new_prev_s = decoder_attention_forward(s_t, prev_s, params)
    ct_d = jax.block_until_ready(ct_d)
    assert ct_d.shape == (B, H) and new_prev_s.shape == (B, T + 1, H)
    ref1 = _reference_forward(s_t, prev_s, params)
    if not jnp.allclose(ct_d, ref1, **TOL):
        raise AssertionError("forward: Pallas result does not match reference")

    # Stateful decode: empty history -> zero context (PyTorch prev_s=None case).
    state = init_decoder_attention_state(B, H, MAX_T)
    ct0, state0 = decoder_attention_step(s_t, state, params)
    ct0 = jax.block_until_ready(ct0)
    if not jnp.allclose(ct0, 0.0, atol=1e-6):
        raise AssertionError("step: empty history should give a zero context")
    assert int(state0["length"][0]) == 1

    # Stateful decode: fill the cache with the same history, two consecutive
    # steps reuse the fixed-shape caches (no retrace, no history copy).
    state = init_decoder_attention_state(B, H, MAX_T)
    state["prev_s"] = state["prev_s"].at[:, :T, :].set(
        prev_s.astype(state["prev_s"].dtype))
    state["prev_proj"] = state["prev_proj"].at[:, :T, :].set(
        jnp.einsum('bth,hk->btk', prev_s,
                   params["W_prev"]).astype(state["prev_proj"].dtype))
    state["length"] = jnp.array([T], jnp.int32)

    ct1, state = decoder_attention_step(s_t, state, params)
    ct2, state = decoder_attention_step(s_t2, state, params)
    ct2 = jax.block_until_ready(ct2)

    if not jnp.allclose(ct1, ref1, **TOL):
        raise AssertionError("cached step 1 does not match reference")
    ref2 = _reference_forward(
        s_t2, jnp.concatenate([prev_s, s_t[:, None, :]], axis=1), params)
    if not jnp.allclose(ct2, ref2, **TOL):
        raise AssertionError("cached step 2 does not match reference")
    assert int(state["length"][0]) == T + 2

    print("KERNEL_OK")
</pallas_src>

<mosaic_0001>
module attributes {stable_mosaic.version = 11 : i64} {
  func.func @_intra_attn_kernel(%arg0: i32, %arg1: memref<1xi32, #tpu.memory_space<smem>>, %arg2: memref<2x128x32xbf16, #tpu.memory_space<vmem>>, %arg3: memref<2x128x32xbf16, #tpu.memory_space<vmem>>, %arg4: memref<2x32xbf16, #tpu.memory_space<vmem>>, %arg5: memref<1x32xbf16, #tpu.memory_space<vmem>>, %arg6: memref<2x32xf32, #tpu.memory_space<vmem>>) attributes {dimension_semantics = [#tpu.dimension_semantics<parallel>], iteration_bounds = array<i64: 1>, scalar_prefetch = 1 : i64, scratch_operands = 0 : i64, tpu.core_type = #tpu.core_type<tc>, window_params = [{transform_indices = @transform_0, window_bounds = array<i64: 2, 128, 32>}, {transform_indices = @transform_1, window_bounds = array<i64: 2, 128, 32>}, {transform_indices = @transform_2, window_bounds = array<i64: 2, 32>}, {pipeline_mode = #tpu.pipeline_mode<synchronous>, transform_indices = @transform_3, window_bounds = array<i64: 1, 32>}, {transform_indices = @transform_4, window_bounds = array<i64: 2, 32>}]} {
    %c0 = arith.constant 0 : index
    %c0_0 = arith.constant 0 : index
    %c0_1 = arith.constant 0 : index
    %0 = vector.load %arg2[%c0, %c0_0, %c0_1] : memref<2x128x32xbf16, #tpu.memory_space<vmem>>, vector<2x128x32xbf16>
    %c0_2 = arith.constant 0 : index
    %c0_3 = arith.constant 0 : index
    %c0_4 = arith.constant 0 : index
    %1 = vector.load %arg3[%c0_2, %c0_3, %c0_4] : memref<2x128x32xbf16, #tpu.memory_space<vmem>>, vector<2x128x32xbf16>
    %c0_5 = arith.constant 0 : index
    %c0_6 = arith.constant 0 : index
    %2 = vector.load %arg4[%c0_5, %c0_6] : memref<2x32xbf16, #tpu.memory_space<vmem>>, vector<2x32xbf16>
    %3 = vector.shape_cast %2 : vector<2x32xbf16> to vector<2x1x32xbf16>
    %4 = vector.broadcast %3 : vector<2x1x32xbf16> to vector<2x128x32xbf16>
    %5 = arith.addf %1, %4 : vector<2x128x32xbf16>
    %6 = math.tanh %5 : vector<2x128x32xbf16>
    %c0_7 = arith.constant 0 : index
    %c0_8 = arith.constant 0 : index
    %7 = vector.load %arg5[%c0_7, %c0_8] : memref<1x32xbf16, #tpu.memory_space<vmem>>, vector<1x32xbf16>
    %8 = vector.shape_cast %7 : vector<1x32xbf16> to vector<1x1x32xbf16>
    %9 = vector.broadcast %8 : vector<1x1x32xbf16> to vector<2x128x32xbf16>
    %10 = arith.mulf %6, %9 : vector<2x128x32xbf16>
    %11 = arith.extf %10 : vector<2x128x32xbf16> to vector<2x128x32xf32>
    %cst = arith.constant dense<0.000000e+00> : vector<2x128xf32>
    %12 = vector.multi_reduction <add>, %11, %cst [2] : vector<2x128x32xf32> to vector<2x128xf32>
    %13 = tpu.iota {dimensions = array<i32: 1>} : vector<2x128xi32>
    %c0_9 = arith.constant 0 : index
    %14 = memref.load %arg1[%c0_9] : memref<1xi32, #tpu.memory_space<smem>>
    %15 = vector.broadcast %14 : i32 to vector<2x128xi32>
    %16 = arith.cmpi slt, %13, %15 : vector<2x128xi32>
    %cst_10 = arith.constant -1.000000e+30 : f32
    %17 = vector.broadcast %cst_10 : f32 to vector<2x128xf32>
    %18 = arith.select %16, %12, %17 : vector<2x128xi1>, vector<2x128xf32>
    %cst_11 = arith.constant dense<0xFF800000> : vector<2xf32>
    %19 = vector.multi_reduction <maximumf>, %18, %cst_11 [1] : vector<2x128xf32> to vector<2xf32>
    %20 = vector.shape_cast %19 : vector<2xf32> to vector<2x1xf32>
    %21 = vector.broadcast %20 : vector<2x1xf32> to vector<2x128xf32>
    %22 = arith.subf %18, %21 : vector<2x128xf32>
    %23 = math.exp %22 : vector<2x128xf32>
    %cst_12 = arith.constant dense<0.000000e+00> : vector<2xf32>
    %24 = vector.multi_reduction <add>, %23, %cst_12 [1] : vector<2x128xf32> to vector<2xf32>
    %25 = vector.shape_cast %24 : vector<2xf32> to vector<2x1xf32>
    %26 = tpu.reciprocal %25 {approx = true} : vector<2x1xf32> -> vector<2x1xf32>
    %27 = vector.broadcast %26 : vector<2x1xf32> to vector<2x128xf32>
    %28 = arith.mulf %23, %27 : vector<2x128xf32>
    %29 = vector.shape_cast %28 : vector<2x128xf32> to vector<2x1x128xf32>
    %30 = arith.truncf %29 : vector<2x1x128xf32> to vector<2x1x128xbf16>
    "tpu.trace_start"() <{level = 10 : i32, message = "bqt,bth->bqh"}> : () -> ()
    %cst_13 = arith.constant dense<0.000000e+00> : vector<2x1x32xf32>
    %31 = tpu.matmul %30, %0, %cst_13 {dimension_numbers = #tpu.dot_dimension_numbers<[2], [1], [1], [2], [0, 0, 0, 1, 1, 2], [0], [0]>} : vector<2x1x128xbf16>, vector<2x128x32xbf16>, vector<2x1x32xf32> -> vector<2x1x32xf32>
    "tpu.trace_stop"() : () -> ()
    %32 = vector.shape_cast %31 : vector<2x1x32xf32> to vector<2x32xf32>
    %c0_14 = arith.constant 0 : index
    %c0_15 = arith.constant 0 : index
    %33 = vector.load %arg6[%c0_14, %c0_15] : memref<2x32xf32, #tpu.memory_space<vmem>>, vector<2x32xf32>
    tpu.vector_store %arg6[%c0_14, %c0_15], %32 {strides = array<i32>} : memref<2x32xf32, #tpu.memory_space<vmem>>, vector<2x32xf32>,
    return
  }
  func.func @transform_0(%arg0: i32, %arg1: memref<1xi32, #tpu.memory_space<smem>>) -> (i32, i32, i32) {
    %c0_i32 = arith.constant 0 : i32
    %c0_i32_0 = arith.constant 0 : i32
    %c0_i32_1 = arith.constant 0 : i32
    return %arg0, %c0_i32, %c0_i32_0 : i32, i32, i32
  }
  func.func @transform_1(%arg0: i32, %arg1: memref<1xi32, #tpu.memory_space<smem>>) -> (i32, i32, i32) {
    %c0_i32 = arith.constant 0 : i32
    %c0_i32_0 = arith.constant 0 : i32
    %c0_i32_1 = arith.constant 0 : i32
    return %arg0, %c0_i32, %c0_i32_0 : i32, i32, i32
  }
  func.func @transform_2(%arg0: i32, %arg1: memref<1xi32, #tpu.memory_space<smem>>) -> (i32, i32) {
    %c0_i32 = arith.constant 0 : i32
    %c0_i32_0 = arith.constant 0 : i32
    return %arg0, %c0_i32 : i32, i32
  }
  func.func @transform_3(%arg0: i32, %arg1: memref<1xi32, #tpu.memory_space<smem>>) -> (i32, i32) {
    %c0_i32 = arith.constant 0 : i32
    %c0_i32_0 = arith.constant 0 : i32
    %c0_i32_1 = arith.constant 0 : i32
    return %c0_i32, %c0_i32_0 : i32, i32
  }
  func.func @transform_4(%arg0: i32, %arg1: memref<1xi32, #tpu.memory_space<smem>>) -> (i32, i32) {
    %c0_i32 = arith.constant 0 : i32
    %c0_i32_0 = arith.constant 0 : i32
    return %arg0, %c0_i32 : i32, i32
  }
}

</mosaic_0001>

<bundles_post_ra>
// kernel: _intra_attn_pallas.1
= control target key start
LH: loop header
LB: loop body
LE: loop exit
PB: predicated region body
PF: predicated region fallthrough
CT: control target
= control target key end

     0   :  { %v91_v1 = vlaneseq  ;;  %s1478_s0 = inlined_call_operand.<no memory space> [shape: s32[1], index: 0, kind: input, shape index: {}]   ;;  %s1479_s1 = inlined_call_operand.vmem [shape: bf16[2,128,32], index: 1, kind: input, shape index: {}]   ;;  %s1480_s2 = inlined_call_operand.vmem [shape: bf16[2,128,32], index: 2, kind: input, shape index: {}]   ;;  %s1481_s3 = inlined_call_operand.vmem [shape: bf16[2,32], index: 3, kind: input, shape index: {}]   ;;  %s1482_s4 = inlined_call_operand.vmem [shape: bf16[1,32], index: 4, kind: input, shape index: {}]   ;;  %s1483_s5 = inlined_call_operand.hbm [shape: f32[2,32], index: 5, kind: output, shape index: {}]  }
   0x1   :  { %v85_v0 = vld [vmem:[%s1481_s3] sm:$0x1]  ;;  %v70_v15 = vld [vmem:[%s1480_s2 + $0x44] sm:$0xf]  ;;  %v71_v17 = vld [vmem:[%s1480_s2 + $0x48] sm:$0xf] }
   0x2   :  { %v88_v2 = vunpack.i.h.s16 %v85_v0  ;;  %v1049_v3 = vshrl.u32 %v91_v1, 7  ;;  %v823_v4 = vpack.i.b16 %v85_v0, %v85_v0  ;;  %v69_v11 = vld [vmem:[%s1480_s2 + $0x40] sm:$0xf]  ;;  %v54_v16 = vld [vmem:[%s1480_s2 + $0x4] sm:$0xf] }
   0x3   :  { %v53_v13 = vld [vmem:[%s1480_s2] sm:$0xf]  ;;  %v55_v20 = vld [vmem:[%s1480_s2 + $0x8] sm:$0xf]  ;;  %v72_v21 = vld [vmem:[%s1480_s2 + $0x4c] sm:$0xf] }
   0x4   :  { %v90_v5 = vpack.i.b16 %v88_v2, %v88_v2  ;;  %v93_v6 = vsub.s32 0, %v1049_v3  ;;  %v185_v23 = vld [vmem:[%s1482_s4] sm:$0x1]  ;;  %v56_v26 = vld [vmem:[%s1480_s2 + $0xc] sm:$0xf] }
   0x5   :  { %v73_v28 = vld [vmem:[%s1480_s2 + $0x50] sm:$0xf]  ;;  %v187_v33 = vpack.i.b16 %v185_v23, %v185_v23  ;;  %v74_v35 = vld [vmem:[%s1480_s2 + $0x54] sm:$0xf] }
   0x6   :  { %v98_v7 = vrot.slane %v90_v5, %v93_v6  ;;  %v94_v8 = vrot.slane %v823_v4, %v93_v6  ;;  %v57_v30 = vld [vmem:[%s1480_s2 + $0x10] sm:$0xf]  ;;  %v58_v37 = vld [vmem:[%s1480_s2 + $0x14] sm:$0xf] }
   0x7   :  { %v192_v39 = vrot.slane %v187_v33, %v93_v6 }
   0x8   :  { %v107_v9 = vpack.i.b16 %v98_v7, %v98_v7  ;;  %v100_v10 = vpack.i.b16 %v94_v8, %v94_v8 }
   0xa   :  { %v112_v12 = vrot.slane %v107_v9, %v93_v6  ;;  %v105_v14 = vrot.slane %v100_v10, %v93_v6 }
   0xc   :  { %v1067_v18 = vcombine.low %v112_v12, %v112_v12  ;;  %v1069_v19 = vcombine.low %v105_v14, %v105_v14 }
   0xe   :  { %v137_v22 = vadd.bf16 %v1067_v18, %v69_v11  ;;  %v121_v24 = vadd.bf16 %v1069_v19, %v53_v13  ;;  %v138_v25 = vadd.bf16 %v1067_v18, %v70_v15  ;;  %v122_v27 = vadd.bf16 %v1069_v19, %v54_v16 }
   0xf   :  { %v139_v29 = vadd.bf16 %v1067_v18, %v71_v17  ;;  %v123_v31 = vadd.bf16 %v1069_v19, %v55_v20  ;;  %v140_v32 = vadd.bf16 %v1067_v18, %v72_v21  ;;  %v124_v34 = vadd.bf16 %v1069_v19, %v56_v26 }
  0x10   :  { %921 = vtanh.bf16 %v137_v22  ;;  %v141_v36 = vadd.bf16 %v1067_v18, %v73_v28  ;;  %v125_v38 = vadd.bf16 %v1069_v19, %v57_v30 }
  0x11   :  { %923 = vtanh.bf16 %v121_v24 }
  0x12   :  { %925 = vtanh.bf16 %v138_v25 }
  0x13   :  { %927 = vtanh.bf16 %v122_v27 }
  0x14   :  { %929 = vtanh.bf16 %v139_v29 }
  0x15   :  { %931 = vtanh.bf16 %v123_v31 }
  0x16   :  { %933 = vtanh.bf16 %v140_v32 }
  0x17   :  { %935 = vtanh.bf16 %v124_v34 }
  0x18   :  { %11 = vsyncpa [#allocation5], 0  ;;  %937 = vtanh.bf16 %v141_v36  ;;  %v142_v40 = vadd.bf16 %v1067_v18, %v74_v35  ;;  %v126_v41 = vadd.bf16 %v1069_v19, %v58_v37  ;;  %v75_v42 = vld [vmem:[%s1480_s2 + $0x58] sm:$0xf]  ;;  %v1113_v44 = vcombine.low %v192_v39, %v192_v39  ;;  %v76_v47 = vld [vmem:[%s1480_s2 + $0x5c] sm:$0xf] }
  0x19   :  { %939 = vtanh.bf16 %v125_v38  ;;  %v59_v43 = vld [vmem:[%s1480_s2 + $0x18] sm:$0xf]  ;;  %v143_v45 = vadd.bf16 %v1067_v18, %v75_v42  ;;  %v60_v49 = vld [vmem:[%s1480_s2 + $0x1c] sm:$0xf]  ;;  %v77_v52 = vld [vmem:[%s1480_s2 + $0x60] sm:$0xf]  ;;  %v144_v55 = vadd.bf16 %v1067_v18, %v76_v47 }
  0x1a   :  { %941 = vtanh.bf16 %v142_v40  ;;  %v127_v46 = vadd.bf16 %v1069_v19, %v59_v43  ;;  %vm261_vm0 = vcmask 261120   ;;  %v61_v56 = vld [vmem:[%s1480_s2 + $0x20] sm:$0xf]  ;;  %v128_v60 = vadd.bf16 %v1069_v19, %v60_v49  ;;  %v78_v16 = vld [vmem:[%s1480_s2 + $0x64] sm:$0xf] }
  0x1b   :  { %943 = vtanh.bf16 %v126_v41  ;;  %v145_v0 = vadd.bf16 %v1067_v18, %v77_v52  ;;  %v129_v7 = vadd.bf16 %v1069_v19, %v61_v56  ;;  %v62_v17 = vld [vmem:[%s1480_s2 + $0x24] sm:$0xf]  ;;  %v146_v25 = vadd.bf16 %v1067_v18, %v78_v16  ;;  %v79_v30 = vld [vmem:[%s1480_s2 + $0x68] sm:$0xf]  ;;  %v80_v42 = vld [vmem:[%s1480_s2 + $0x6c] sm:$0xf] }
  0x1c   :  { %945 = vtanh.bf16 %v143_v45  ;;  %v130_v26 = vadd.bf16 %v1069_v19, %v62_v17  ;;  %v63_v31 = vld [vmem:[%s1480_s2 + $0x28] sm:$0xf]  ;;  %v147_v37 = vadd.bf16 %v1067_v18, %v79_v30  ;;  %v64_v43 = vld [vmem:[%s1480_s2 + $0x2c] sm:$0xf]  ;;  %v65_v56 = vld [vmem:[%s1480_s2 + $0x30] sm:$0xf] }
  0x1d   :  { %947 = vtanh.bf16 %v127_v46  ;;  %v131_v38 = vadd.bf16 %v1069_v19, %v63_v31  ;;  %v83_v17 = vld [vmem:[%s1480_s2 + $0x78] sm:$0xf]  ;;  %v84_v31 = vld [vmem:[%s1480_s2 + $0x7c] sm:$0xf]  ;;  %vm404_vm1 = vcmask 130112   ;;  %vm411_vm2 = vcmask 195712  }
  0x1e   :  { %v922_v48 = vpop.eup %921  ;;  %949 = vtanh.bf16 %v144_v55  ;;  %v81_v55 = vld [vmem:[%s1480_s2 + $0x70] sm:$0xf]  ;;  %vm418_vm3 = vcmask 261312   ;;  %vm425_vm4 = vcmask 326912   ;;  %vm432_vm5 = vcmask 392512  }
  0x1f   :  { %v924_v50 = vpop.eup %923  ;;  %v213_v51 = vmul.bf16 %v922_v48, %v1113_v44  ;;  %951 = vtanh.bf16 %v128_v60  ;;  %vm439_vm6 = vcmask 458112   ;;  %vm446_vm7 = vcmask 523712  }
  0x20   :  { %v926_v53 = vpop.eup %925  ;;  %v197_v54 = vmul.bf16 %v924_v50, %v1113_v44  ;;  %953 = vtanh.bf16 %v145_v0  ;;  %v148_v50 = vadd.bf16 %v1067_v18, %v80_v42  ;;  %vm453_vm8 = vcmask 589312  }
  0x21   :  { %v928_v57 = vpop.eup %927  ;;  %v245_v58 = vunpack.c.l.bf16 %v213_v51  ;;  %v214_v59 = vmul.bf16 %v926_v53, %v1113_v44  ;;  %955 = vtanh.bf16 %v129_v7  ;;  %v132_v51 = vadd.bf16 %v1069_v19, %v64_v43 }
  0x22   :  { %v930_v61 = vpop.eup %929  ;;  %v229_v62 = vunpack.c.l.bf16 %v197_v54  ;;  %v198_v63 = vmul.bf16 %v928_v57, %v1113_v44  ;;  %957 = vtanh.bf16 %v146_v25  ;;  %vm460_vm9 = vcmask 654912  }
  0x23   :  { %v932_v2 = vpop.eup %931  ;;  %v310_v4 = vsel %vm261_vm0, %v245_v58, 0.0  ;;  %v246_v5 = vunpack.c.l.bf16 %v214_v59  ;;  %v215_v6 = vmul.bf16 %v930_v61, %v1113_v44  ;;  %959 = vtanh.bf16 %v130_v26 }
  0x24   :  { %v934_v8 = vpop.eup %933  ;;  %311 = vadd.xlane.f32.xlu1 %v310_v4  ;;  %v262_v9 = vsel %vm261_vm0, %v229_v62, 0.0  ;;  %v230_v10 = vunpack.c.l.bf16 %v198_v63  ;;  %v199_v11 = vmul.bf16 %v932_v2, %v1113_v44  ;;  %961 = vtanh.bf16 %v147_v37 }
  0x25   :  { %v936_v12 = vpop.eup %935  ;;  %263 = vadd.xlane.f32.xlu0 %v262_v9  ;;  %v313_v13 = vsel %vm261_vm0, %v246_v5, 0.0  ;;  %v247_v14 = vunpack.c.l.bf16 %v215_v6  ;;  %v216_v15 = vmul.bf16 %v934_v8, %v1113_v44  ;;  %963 = vtanh.bf16 %v131_v38  ;;  %v82_v5 = vld [vmem:[%s1480_s2 + $0x74] sm:$0xf] }
  0x26   :  { %v938_v20 = vpop.eup %937  ;;  %v265_v21 = vsel %vm261_vm0, %v230_v10, 0.0  ;;  %v231_v22 = vunpack.c.l.bf16 %v199_v11  ;;  %v200_v23 = vmul.bf16 %v936_v12, %v1113_v44  ;;  %965 = vtanh.bf16 %v148_v50  ;;  %v66_v6 = vld [vmem:[%s1480_s2 + $0x34] sm:$0xf] }
  0x27   :  { %v940_v24 = vpop.eup %939  ;;  %v316_v27 = vsel %vm261_vm0, %v247_v14, 0.0  ;;  %v248_v28 = vunpack.c.l.bf16 %v216_v15  ;;  %v217_v29 = vmul.bf16 %v938_v20, %v1113_v44  ;;  %v149_v62 = vadd.bf16 %v1067_v18, %v81_v55  ;;  %v67_v20 = vld [vmem:[%s1480_s2 + $0x38] sm:$0xf] }
  0x28   :  { %314 = vadd.xlane.f32.xlu1 %v313_v13  ;;  %v942_v32 = vpop.eup %941  ;;  %v268_v33 = vsel %vm261_vm0, %v231_v22, 0.0  ;;  %v232_v34 = vunpack.c.l.bf16 %v200_v23  ;;  %v201_v35 = vmul.bf16 %v940_v24, %v1113_v44  ;;  %v133_v63 = vadd.bf16 %v1069_v19, %v65_v56 }
  0x29   :  { %266 = vadd.xlane.f32.xlu0 %v265_v21  ;;  %v944_v36 = vpop.eup %943  ;;  %v319_v39 = vsel %vm261_vm0, %v248_v28, 0.0  ;;  %v249_v40 = vunpack.c.l.bf16 %v217_v29  ;;  %v218_v41 = vmul.bf16 %v942_v32, %v1113_v44  ;;  %967 = vtanh.bf16 %v132_v51  ;;  %v68_v32 = vld [vmem:[%s1480_s2 + $0x3c] sm:$0xf] }
  0x2a   :  { %v946_v45 = vpop.eup %945  ;;  %v271_v46 = vsel %vm261_vm0, %v232_v34, 0.0  ;;  %v233_v47 = vunpack.c.l.bf16 %v201_v35  ;;  %v202_v48 = vmul.bf16 %v944_v36, %v1113_v44  ;;  %969 = vtanh.bf16 %v149_v62 }
  0x2b   :  { %v948_v49 = vpop.eup %947  ;;  %v322_v52 = vsel %vm261_vm0, %v249_v40, 0.0  ;;  %v250_v53 = vunpack.c.l.bf16 %v218_v41  ;;  %v219_v54 = vmul.bf16 %v946_v45, %v1113_v44  ;;  %v150_v12 = vadd.bf16 %v1067_v18, %v82_v5 }
  0x2c   :  { %317 = vadd.xlane.f32.xlu1 %v316_v27  ;;  %v950_v57 = vpop.eup %949  ;;  %v274_v58 = vsel %vm261_vm0, %v233_v47, 0.0  ;;  %v234_v59 = vunpack.c.l.bf16 %v202_v48  ;;  %v203_v60 = vmul.bf16 %v948_v49, %v1113_v44  ;;  %v134_v13 = vadd.bf16 %v1069_v19, %v66_v6 }
  0x2d   :  { %269 = vadd.xlane.f32.xlu0 %v268_v33  ;;  %v952_v61 = vpop.eup %951  ;;  %v325_v0 = vsel %vm261_vm0, %v250_v53, 0.0  ;;  %v251_v2 = vunpack.c.l.bf16 %v219_v54  ;;  %v220_v4 = vmul.bf16 %v950_v57, %v1113_v44  ;;  %971 = vtanh.bf16 %v133_v63 }
  0x2e   :  { %v954_v7 = vpop.eup %953  ;;  %v277_v8 = vsel %vm261_vm0, %v234_v59, 0.0  ;;  %v235_v9 = vunpack.c.l.bf16 %v203_v60  ;;  %v204_v10 = vmul.bf16 %v952_v61, %v1113_v44  ;;  %973 = vtanh.bf16 %v150_v12 }
  0x2f   :  { %v956_v11 = vpop.eup %955  ;;  %v328_v14 = vsel %vm261_vm0, %v251_v2, 0.0  ;;  %v252_v15 = vunpack.c.l.bf16 %v220_v4  ;;  %v221_v16 = vmul.bf16 %v954_v7, %v1113_v44  ;;  %v151_v26 = vadd.bf16 %v1067_v18, %v83_v17 }
  0x30   :  { %320 = vadd.xlane.f32.xlu1 %v319_v39  ;;  %v958_v21 = vpop.eup %957  ;;  %v280_v22 = vsel %vm261_vm0, %v235_v9, 0.0  ;;  %v236_v23 = vunpack.c.l.bf16 %v204_v10  ;;  %v205_v24 = vmul.bf16 %v956_v11, %v1113_v44  ;;  %v135_v27 = vadd.bf16 %v1069_v19, %v67_v20 }
  0x31   :  { %272 = vadd.xlane.f32.xlu0 %v271_v46  ;;  %v960_v25 = vpop.eup %959  ;;  %v331_v28 = vsel %vm261_vm0, %v252_v15, 0.0  ;;  %v253_v29 = vunpack.c.l.bf16 %v221_v16  ;;  %v222_v30 = vmul.bf16 %v958_v21, %v1113_v44  ;;  %975 = vtanh.bf16 %v134_v13 }
  0x32   :  { %v962_v33 = vpop.eup %961  ;;  %v283_v34 = vsel %vm261_vm0, %v236_v23, 0.0  ;;  %v237_v35 = vunpack.c.l.bf16 %v205_v24  ;;  %v206_v36 = vmul.bf16 %v960_v25, %v1113_v44  ;;  %977 = vtanh.bf16 %v151_v26 }
  0x33   :  { %v964_v37 = vpop.eup %963  ;;  %v152_v38 = vadd.bf16 %v1067_v18, %v84_v31  ;;  %v136_v39 = vadd.bf16 %v1069_v19, %v68_v32  ;;  %v334_v40 = vsel %vm261_vm0, %v253_v29, 0.0  ;;  %v254_v41 = vunpack.c.l.bf16 %v222_v30 }
  0x34   :  { %323 = vadd.xlane.f32.xlu1 %v322_v52  ;;  %v223_v42 = vmul.bf16 %v962_v33, %v1113_v44  ;;  %979 = vtanh.bf16 %v135_v27  ;;  %v966_v43 = vpop.eup %965  ;;  %v286_v45 = vsel %vm261_vm0, %v237_v35, 0.0  ;;  %v238_v46 = vunpack.c.l.bf16 %v206_v36 }
  0x35   :  { %275 = vadd.xlane.f32.xlu0 %v274_v58  ;;  %v207_v47 = vmul.bf16 %v964_v37, %v1113_v44  ;;  %981 = vtanh.bf16 %v152_v38  ;;  %v337_v18 = vsel %vm261_vm0, %v254_v41, 0.0  ;;  %v224_v49 = vmul.bf16 %v966_v43, %v1113_v44 }
  0x36   :  { %v255_v19 = vunpack.c.l.bf16 %v223_v42  ;;  %983 = vtanh.bf16 %v136_v39  ;;  %v289_v51 = vsel %vm261_vm0, %v238_v46, 0.0  ;;  %vm467_vm10 = vcmask 720512  }
  0x37   :  { %v968_v48 = vpop.eup %967  ;;  %v239_v52 = vunpack.c.l.bf16 %v207_v47  ;;  %v256_v56 = vunpack.c.l.bf16 %v224_v49  ;;  %vm474_vm11 = vcmask 786112   ;;  %vm481_vm12 = vcmask 851712  }
  0x38   :  { %326 = vadd.xlane.f32.xlu1 %v325_v0  ;;  %v970_v50 = vpop.eup %969  ;;  %v208_v53 = vmul.bf16 %v968_v48, %v1113_v44  ;;  %v340_v55 = vsel %vm261_vm0, %v255_v19, 0.0  ;;  %v1288_v48 = vand.u32 127, %v91_v1  ;;  %vm488_vm13 = vcmask 917312  }
  0x39   :  { %278 = vadd.xlane.f32.xlu0 %v277_v8  ;;  %v225_v57 = vmul.bf16 %v970_v50, %v1113_v44  ;;  %v292_v59 = vsel %vm261_vm0, %v239_v52, 0.0  ;;  %v343_v63 = vsel %vm261_vm0, %v256_v56, 0.0  ;;  %vm495_vm14 = vcmask 982912  }
  0x3a   :  { %v240_v60 = vunpack.c.l.bf16 %v208_v53  ;;  %v399_v19 = vadd.s32 4294967288, %v1288_v48  ;;  %v406_v49 = vadd.s32 4294967280, %v1288_v48  ;;  %v413_v50 = vadd.s32 4294967272, %v1288_v48 }
  0x3b   :  { %v972_v54 = vpop.eup %971  ;;  %v257_v0 = vunpack.c.l.bf16 %v225_v57  ;;  %v420_v52 = vadd.s32 4294967264, %v1288_v48  ;;  %v427_v1 = vadd.s32 4294967256, %v1288_v48  ;;  %v434_v57 = vadd.s32 4294967248, %v1288_v48 }
  0x3c   :  { %329 = vadd.xlane.f32.xlu1 %v328_v14  ;;  %v974_v58 = vpop.eup %973  ;;  %v209_v61 = vmul.bf16 %v972_v54, %v1113_v44  ;;  %v295_v5 = vsel %vm261_vm0, %v240_v60, 0.0  ;;  %v397_v54 = vsub.s32 %v1288_v48, %v1049_v3  ;;  %v409_v56 = vsub.s32 %v406_v49, %v1049_v3 }
  0x3d   :  { %281 = vadd.xlane.f32.xlu0 %v280_v22  ;;  %v226_v2 = vmul.bf16 %v974_v58, %v1113_v44  ;;  %v346_v9 = vsel %vm261_vm0, %v257_v0, 0.0  ;;  %v416_v58 = vsub.s32 %v413_v50, %v1049_v3  ;;  %v448_v60 = vadd.s32 4294967232, %v1288_v48 }
  0x3e   :  { %v241_v6 = vunpack.c.l.bf16 %v209_v61  ;;  %v462_v0 = vadd.s32 4294967216, %v1288_v48  ;;  %vm502_vm15 = vcmask 1048512  }
  0x3f   :  { %v976_v62 = vpop.eup %975  ;;  %v258_v10 = vunpack.c.l.bf16 %v226_v2 }
  0x40   :  { %332 = vadd.xlane.f32.xlu1 %v331_v28  ;;  %v978_v4 = vpop.eup %977  ;;  %v210_v7 = vmul.bf16 %v976_v62, %v1113_v44  ;;  %v298_v13 = vsel %vm261_vm0, %v241_v6, 0.0  ;;  %v423_v62 = vsub.s32 %v420_v52, %v1049_v3  ;;  %v476_v6 = vadd.s32 4294967200, %v1288_v48 }
  0x41   :  { %284 = vadd.xlane.f32.xlu0 %v283_v34  ;;  %v227_v11 = vmul.bf16 %v978_v4, %v1113_v44  ;;  %v349_v17 = vsel %vm261_vm0, %v258_v10, 0.0  ;;  %v430_v4 = vsub.s32 %v427_v1, %v1049_v3  ;;  %v1323_v10 = vsub.s32 %v448_v60, %v1049_v3 }
  0x42   :  { %v980_v8 = vpop.eup %979  ;;  %v242_v14 = vunpack.c.l.bf16 %v210_v7  ;;  %v437_v7 = vsub.s32 %v434_v57, %v1049_v3 }
  0x43   :  { %v982_v12 = vpop.eup %981  ;;  %v211_v15 = vmul.bf16 %v980_v8, %v1113_v44  ;;  %v259_v20 = vunpack.c.l.bf16 %v227_v11  ;;  %v483_v8 = vadd.s32 4294967192, %v1288_v48 }
  0x44   :  { %335 = vadd.xlane.f32.xlu1 %v334_v40  ;;  %v984_v16 = vpop.eup %983  ;;  %v228_v21 = vmul.bf16 %v982_v12, %v1113_v44  ;;  %v301_v22 = vsel %vm261_vm0, %v242_v14, 0.0  ;;  %v490_v12 = vadd.s32 4294967184, %v1288_v48 }
  0x45   :  { %287 = vadd.xlane.f32.xlu0 %v286_v45  ;;  %v243_v23 = vunpack.c.l.bf16 %v211_v15  ;;  %v212_v24 = vmul.bf16 %v984_v16, %v1113_v44  ;;  %v352_v25 = vsel %vm261_vm0, %v259_v20, 0.0  ;;  %v1333_v15 = vsub.s32 %v462_v0, %v1049_v3 }
  0x46   :  { %v260_v26 = vunpack.c.l.bf16 %v228_v21 }
  0x47   :  { %v304_v27 = vsel %vm261_vm0, %v243_v23, 0.0  ;;  %v244_v28 = vunpack.c.l.bf16 %v212_v24  ;;  %v1344_v23 = vsub.s32 %v476_v6, %v1049_v3 }
  0x48   :  { %338 = vadd.xlane.f32.xlu1 %v337_v18  ;;  %v355_v29 = vsel %vm261_vm0, %v260_v26, 0.0 }
  0x49   :  { %290 = vadd.xlane.f32.xlu0 %v289_v51  ;;  %v307_v30 = vsel %vm261_vm0, %v244_v28, 0.0  ;;  %vm583_vm0 = vcmask 1041409  }
  0x4c   :  { %341 = vadd.xlane.f32.xlu1 %v340_v55  ;;  %v402_v55 = vsub.s32 %v399_v19, %v1049_v3 }
  0x4d   :  { %293 = vadd.xlane.f32.xlu0 %v292_v59  ;;  %v441_v59 = vadd.s32 4294967240, %v1288_v48 }
  0x50   :  { %344 = vadd.xlane.f32.xlu1 %v343_v63  ;;  %v455_v63 = vadd.s32 4294967224, %v1288_v48 }
  0x51   :  { %296 = vadd.xlane.f32.xlu0 %v295_v5  ;;  %v469_v5 = vadd.s32 4294967208, %v1288_v48 }
  0x52   :  { %v1330_v14 = vsub.s32 %v455_v63, %v1049_v3 }
  0x54   :  { %347 = vadd.xlane.f32.xlu1 %v346_v9  ;;  %v444_v9 = vsub.s32 %v441_v59, %v1049_v3 }
  0x55   :  { %299 = vadd.xlane.f32.xlu0 %v298_v13 }
  0x58   :  { %350 = vadd.xlane.f32.xlu1 %v349_v17  ;;  %v497_v17 = vadd.s32 4294967176, %v1288_v48 }
  0x59   :  { %302 = vadd.xlane.f32.xlu0 %v301_v22  ;;  %v1341_v22 = vsub.s32 %v469_v5, %v1049_v3 }
  0x5a   :  { %v1362_v19 = vsub.s32 %v497_v17, %v1049_v3 }
  0x5c   :  { %353 = vadd.xlane.f32.xlu1 %v352_v25 }
  0x5d   :  { %305 = vadd.xlane.f32.xlu0 %v304_v27  ;;  %v1350_v27 = vsub.s32 %v483_v8, %v1049_v3 }
  0x60   :  { %356 = vadd.xlane.f32.xlu1 %v355_v29 }
  0x61   :  { %308 = vadd.xlane.f32.xlu0 %v307_v30 }
  0xad   :  { %v1253_v31 = vpop.xlane.xlu1 %311 }
  0xae   :  { %v1255_v32 = vpop.xlane.xlu0 %263  ;;  %v507_v24 = vrot.slane %v1253_v31, %v397_v54 }
  0xaf   :  { %v398_v28 = vrot.slane %v1255_v32, %v397_v54 }
  0xb1   :  { %v1257_v44 = vpop.xlane.xlu1 %314 }
  0xb2   :  { %v1259_v33 = vpop.xlane.xlu0 %266  ;;  %v511_v13 = vrot.slane %v1257_v44, %v402_v55 }
  0xb3   :  { %v403_v20 = vrot.slane %v1259_v33, %v402_v55  ;;  %v1356_v33 = vsub.s32 %v490_v12, %v1049_v3 }
  0xb4   :  { %v512_v31 = vsel %vm404_vm1, %v511_v13, %v507_v24 }
  0xb5   :  { %v1261_v34 = vpop.xlane.xlu1 %317  ;;  %v405_v32 = vsel %vm404_vm1, %v403_v20, %v398_v28 }
  0xb6   :  { %v1263_v35 = vpop.xlane.xlu0 %269  ;;  %v516_v21 = vrot.slane %v1261_v34, %v409_v56 }
  0xb7   :  { %v410_v25 = vrot.slane %v1263_v35, %v409_v56 }
  0xb9   :  { %v1265_v36 = vpop.xlane.xlu1 %320  ;;  %v412_v50 = vsel %vm411_vm2, %v410_v25, %v405_v32  ;;  %v1011_v32 = vmov 0.0  }
  0xba   :  { %v1267_v37 = vpop.xlane.xlu0 %272  ;;  %v521_v26 = vrot.slane %v1265_v36, %v416_v58  ;;  %861 = vmatprep.subr.bf16.mxu0 %v1011_v32  ;;  %881 = vmatprep.subr.bf16.mxu1 %v1011_v32 }
  0xbb   :  { %v417_v29 = vrot.slane %v1267_v37, %v416_v58  ;;  %v517_v37 = vsel %vm411_vm2, %v516_v21, %v512_v31  ;;  %vm587_vm2 = vcmask 1041408  }
  0xbd   :  { %v1269_v38 = vpop.xlane.xlu1 %323  ;;  %v419_v54 = vsel %vm418_vm3, %v417_v29, %v412_v50 }
  0xbe   :  { %v1271_v39 = vpop.xlane.xlu0 %275  ;;  %v526_v30 = vrot.slane %v1269_v38, %v423_v62 }
  0xbf   :  { %v424_v34 = vrot.slane %v1271_v39, %v423_v62  ;;  %v522_v39 = vsel %vm418_vm3, %v521_v26, %v517_v37  ;;  %v908_v37 = vld [vmem:[%s1479_s1 + $0x70] sm:$0xff]   ;;  %vm1012_vm3 = vmmov 0  }
  0xc0   :  { %v527_v1 = vsel %vm425_vm4, %v526_v30, %v522_v39  ;;  %877 = vmatprep.mubr.msk.bf16.mxu0 %vm1012_vm3, %v1011_v32  ;;  %897 = vmatprep.mubr.msk.bf16.mxu1 %vm1012_vm3, %v1011_v32 }
  0xc1   :  { %v1273_v40 = vpop.xlane.xlu1 %326 }
  0xc2   :  { %v1275_v41 = vpop.xlane.xlu0 %278  ;;  %v531_v35 = vrot.slane %v1273_v40, %v430_v4 }
  0xc3   :  { %v431_v38 = vrot.slane %v1275_v41, %v430_v4 }
  0xc4   :  { %v532_v57 = vsel %vm432_vm5, %v531_v35, %v527_v1  ;;  %v911_v1 = vld [vmem:[%s1479_s1 + $0x20] sm:$0xff]  }
  0xc5   :  { %v1277_v42 = vpop.xlane.xlu1 %329 }
  0xc6   :  { %v1279_v43 = vpop.xlane.xlu0 %281  ;;  %v536_v49 = vrot.slane %v1277_v42, %v437_v7  ;;  %v426_v42 = vsel %vm425_vm4, %v424_v34, %v419_v54  ;;  %v910_v54 = vld [vmem:[%s1479_s1 + $0x68] sm:$0xff]   ;;  %vm807_vm4 = vcmask 254976  }
  0xc7   :  { %v438_v40 = vrot.slane %v1279_v43, %v437_v7  ;;  %v433_v59 = vsel %vm432_vm5, %v431_v38, %v426_v42  ;;  %v915_v42 = vld [vmem:[%s1479_s1 + $0x10] sm:$0xff]  }
  0xc8   :  { %v537_v60 = vsel %vm439_vm6, %v536_v49, %v532_v57  ;;  %v916_v57 = vld [vmem:[%s1479_s1 + $0x50] sm:$0xff]  }
  0xc9   :  { %v1281_v45 = vpop.xlane.xlu1 %332  ;;  %v440_v62 = vsel %vm439_vm6, %v438_v40, %v433_v59  ;;  %v920_v59 = vld [vmem:[%s1479_s1 + $0x40] sm:$0xff]  }
  0xca   :  { %v1283_v46 = vpop.xlane.xlu0 %284  ;;  %v541_v52 = vrot.slane %v1281_v45, %v444_v9 }
  0xcb   :  { %v445_v55 = vrot.slane %v1283_v46, %v444_v9 }
  0xcc   :  { %v542_v63 = vsel %vm446_vm7, %v541_v52, %v537_v60  ;;  %v909_v52 = vld [vmem:[%s1479_s1 + $0x28] sm:$0xff]  }
  0xcd   :  { %v1285_v47 = vpop.xlane.xlu1 %335  ;;  %v447_v0 = vsel %vm446_vm7, %v445_v55, %v440_v62  ;;  %v912_v55 = vld [vmem:[%s1479_s1 + $0x60] sm:$0xff]  }
  0xce   :  { %v1290_v18 = vpop.xlane.xlu0 %287  ;;  %v546_v41 = vrot.slane %v1285_v47, %v1323_v10 }
  0xcf   :  { %v452_v58 = vrot.slane %v1290_v18, %v1323_v10 }
  0xd0   :  { %v547_v4 = vsel %vm453_vm8, %v546_v41, %v542_v63  ;;  %v913_v41 = vld [vmem:[%s1479_s1 + $0x18] sm:$0xff]  }
  0xd1   :  { %v1295_v51 = vpop.xlane.xlu1 %338  ;;  %v454_v6 = vsel %vm453_vm8, %v452_v58, %v447_v0  ;;  %v917_v58 = vld [vmem:[%s1479_s1 + $0x8] sm:$0xff]  }
  0xd2   :  { %v1298_v53 = vpop.xlane.xlu0 %290  ;;  %v551_v43 = vrot.slane %v1295_v51, %v1330_v14 }
  0xd3   :  { %v459_v46 = vrot.slane %v1298_v53, %v1330_v14 }
  0xd4   :  { %v552_v7 = vsel %vm460_vm9, %v551_v43, %v547_v4  ;;  %v918_v43 = vld [vmem:[%s1479_s1 + $0x48] sm:$0xff]  }
  0xd5   :  { %v1309_v61 = vpop.xlane.xlu1 %341  ;;  %v461_v10 = vsel %vm460_vm9, %v459_v46, %v454_v6  ;;  %v1013_v46 = vmov 1966171168  }
  0xd6   :  { %v1314_v2 = vpop.xlane.xlu0 %293  ;;  %v556_v47 = vrot.slane %v1309_v61, %v1333_v15 }
  0xd7   :  { %v466_v18 = vrot.slane %v1314_v2, %v1333_v15 }
  0xd9   :  { %v1325_v11 = vpop.xlane.xlu1 %344  ;;  %v468_v14 = vsel %vm467_vm10, %v466_v18, %v461_v10 }
  0xda   :  { %v1335_v16 = vpop.xlane.xlu0 %296  ;;  %v561_v51 = vrot.slane %v1325_v11, %v1341_v22  ;;  %v557_v11 = vsel %vm467_vm10, %v556_v47, %v552_v7  ;;  %v601_v47 = vunpack.c.l.s4 %v1013_v46 }
  0xdb   :  { %v473_v53 = vrot.slane %v1335_v16, %v1341_v22  ;;  %v361_v22 = vstv %s1478_s0 }
  0xdc   :  { %v562_v15 = vsel %vm474_vm11, %v561_v51, %v557_v11  ;;  %vm362_vm1 = vcmp.lt.s32.totalorder %v1288_v48, %v361_v22  ;;  %v907_v48 = vld [vmem:[%s1479_s1 + $0x30] sm:$0xff]   ;;  %v602_v62 = vunpack.c.0.s8 %v601_v47 }
  0xdd   :  { %v348_v44 = vpop.xlane.xlu1 %347  ;;  %v475_v17 = vsel %vm474_vm11, %v473_v53, %v468_v14 }
  0xde   :  { %v300_v36 = vpop.xlane.xlu0 %299  ;;  %v566_v5 = vrot.slane %v348_v44, %v1344_v23  ;;  %v605_v63 = vsub.s32 %v602_v62, %v1049_v3 }
  0xdf   :  { %v480_v8 = vrot.slane %v300_v36, %v1344_v23  ;;  %v905_v36 = vld [vmem:[%s1479_s1 + $0x38] sm:$0xff]  }
  0xe0   :  { %v567_v20 = vsel %vm481_vm12, %v566_v5, %v562_v15  ;;  %862 = vmatpush3.bf16.msra.mxu0 %v905_v36 }
  0xe1   :  { %v351_v56 = vpop.xlane.xlu1 %350  ;;  %v482_v23 = vsel %vm481_vm12, %v480_v8, %v475_v17  ;;  %863 = vmatprep.subr.bf16.mxu0 %v1011_v32 }
  0xe2   :  { %v303_v45 = vpop.xlane.xlu0 %302  ;;  %v571_v2 = vrot.slane %v351_v56, %v1350_v27  ;;  %v914_v56 = vld [vmem:[%s1479_s1 + $0x58] sm:$0xff]  }
  0xe3   :  { %v487_v12 = vrot.slane %v303_v45, %v1350_v27  ;;  %v919_v45 = vld [vmem:[%s1479_s1] sm:$0xff]  }
  0xe4   :  { %v572_v24 = vsel %vm488_vm13, %v571_v2, %v567_v20  ;;  %864 = vmatpush3.bf16.msra.mxu0 %v907_v48 }
  0xe5   :  { %v354_v61 = vpop.xlane.xlu1 %353  ;;  %v489_v27 = vsel %vm488_vm13, %v487_v12, %v482_v23  ;;  %865 = vmatprep.subr.bf16.mxu0 %v1011_v32 }
  0xe6   :  { %v306_v9 = vpop.xlane.xlu0 %305  ;;  %v576_v13 = vrot.slane %v354_v61, %v1356_v33 }
  0xe7   :  { %v494_v16 = vrot.slane %v306_v9, %v1356_v33 }
  0xe8   :  { %v577_v28 = vsel %vm495_vm14, %v576_v13, %v572_v24  ;;  %866 = vmatpush3.bf16.msra.mxu0 %v909_v52 }
  0xe9   :  { %v357_v21 = vpop.xlane.xlu1 %356  ;;  %v496_v30 = vsel %vm495_vm14, %v494_v16, %v489_v27  ;;  %867 = vmatprep.subr.bf16.mxu0 %v1011_v32 }
  0xea   :  { %v581_v25 = vrot.slane %v357_v21, %v1362_v19  ;;  %v309_v26 = vpop.xlane.xlu0 %308 }
  0xeb   :  { %v501_v29 = vrot.slane %v309_v26, %v1362_v19  ;;  %v906_v19 = vld [vmem:[%s1479_s1 + $0x78] sm:$0xff]   ;;  %s1014_s1 = smov [#allocation4]  }
  0xec   :  { %v582_v44 = vsel %vm502_vm15, %v581_v25, %v577_v28  ;;  %882 = vmatpush3.bf16.msra.mxu1 %v906_v19  ;;  %868 = vmatpush3.bf16.msra.mxu0 %v911_v1  ;;  %s815_s9 = sshll.u32 %s1014_s1, 4  ;;  %s816_s9 = int_to_ptr.vmem [resolvable:$true] %s815_s9 }
  0xed   :  { %v503_v33 = vsel %vm502_vm15, %v501_v29, %v496_v30  ;;  %883 = vmatprep.subr.bf16.mxu1 %v1011_v32  ;;  %869 = vmatprep.subr.bf16.mxu0 %v1011_v32  ;;  %s989_s10 = scalar_lea.vmem %s816_s9, 32  ;;  %p994_p1 = scmp.lt.s32.totalorder %s816_s9, %s816_s9 }
  0xee   :  { %v584_v31 = vsel %vm583_vm0, %v582_v44, %v503_v33  ;;  %p990_p0 = scmp.ne.s32.totalorder %s816_s9, %s989_s10  ;;  %p995_p2 = scmp.lt.s32.totalorder %s989_s10, %s989_s10 }
  0xef   :  { %v586_v34 = vsel %vm362_vm1, %v584_v31, -1e+30 }
  0xf0   :  { %v588_v35 = vsel %vm587_vm2, %v586_v34, -inf  ;;  %884 = vmatpush3.bf16.msra.mxu1 %v908_v37  ;;  %870 = vmatpush3.bf16.msra.mxu0 %v913_v41  ;;  %p996_p3 = por %p995_p2, %p994_p1 }
  0xf1   :  { %589 = vmax.xlane.f32.xlu0 %v588_v35  ;;  %885 = vmatprep.subr.bf16.mxu1 %v1011_v32 }
  0xf2   :  { %871 = vmatprep.subr.bf16.mxu0 %v1011_v32  ;;  %p997_p4 = pnand %p996_p3, %p990_p0 }
  0xf4   :  { %886 = vmatpush3.bf16.msra.mxu1 %v910_v54  ;;  %872 = vmatpush3.bf16.msra.mxu0 %v915_v42 }
  0xf5   :  { %887 = vmatprep.subr.bf16.mxu1 %v1011_v32  ;;  %873 = vmatprep.subr.bf16.mxu0 %v1011_v32 }
  0xf8   :  { %888 = vmatpush3.bf16.msra.mxu1 %v912_v55  ;;  %874 = vmatpush3.bf16.msra.mxu0 %v917_v58 }
  0xf9   :  { %889 = vmatprep.subr.bf16.mxu1 %v1011_v32  ;;  %875 = vmatprep.subr.bf16.mxu0 %v1011_v32 }
  0xfc   :  { %890 = vmatpush3.bf16.msra.mxu1 %v914_v56  ;;  %876 = vmatpush3.bf16.msra.mxu0 %v919_v45 }
  0xfd   :  { %891 = vmatprep.subr.bf16.mxu1 %v1011_v32 }
 0x100   :  { %892 = vmatpush3.bf16.msra.mxu1 %v916_v57 }
 0x101   :  { %893 = vmatprep.subr.bf16.mxu1 %v1011_v32 }
 0x104   :  { %894 = vmatpush3.bf16.msra.mxu1 %v918_v43 }
 0x105   :  { %895 = vmatprep.subr.bf16.mxu1 %v1011_v32 }
 0x108   :  { %896 = vmatpush3.bf16.msra.mxu1 %v920_v59 }
 0x17a   :  { %v590_v38 = vpop.xlane.xlu0 %589 }
 0x17b   :  { %v591_v49 = vsub.f32 %v586_v34, %v590_v38 }
 0x17d   :  { %v592_v50 = vmul.f32 1.442695, %v591_v49 }
 0x17f   :  { %985 = vpow2.f32 %v592_v50 }
 0x18c   :  { %v986_v39 = vpop.eup %985 }
 0x18d   :  { %v594_v40 = vsel %vm587_vm2, %v986_v39, 0.0 }
 0x18e   :  { %595 = vadd.xlane.f32.xlu1 %v594_v40 }
 0x217   :  { %v596_v60 = vpop.xlane.xlu1 %595 }
 0x218   :  { %987 = vrcp.f32 %v596_v60 }
 0x225   :  { %v988_v18 = vpop.eup %987 }
 0x226   :  { %v598_v51 = vmul.f32 %v988_v18, %v986_v39 }
 0x228   :  { %v606_v0 = vrot.slane %v598_v51, %v605_v63 }
 0x22a   :  { %v614_v4 = vrot.slane %v606_v0, %v605_v63  ;;  %v607_v53 = vcombine.high %v606_v0, %v606_v0 }
 0x22c   :  { %v624_v5 = vpack.c.bf16 %v614_v4, %v614_v4  ;;  %v621_v61 = vrot.slane %v607_v53, %v605_v63 }
 0x22e   :  { %878 = vmatmul.mubr.bf16.vlgmr.msra.gmra.mxu0 %v624_v5  ;;  %v625_v6 = vpack.c.bf16 %v621_v61, %v621_v61 }
 0x230   :  { %898 = vmatmul.mubr.bf16.vlgmr.msra.gmra.mxu1 %v625_v6 }
 0x2ee   :  { %v708_v7 = vpop.f32.mrf.mxu0 }
 0x2f0   :  { %v879_v8 = vpop.f32.mrf.mxu0  ;;  %v796_v2 = vpop.f32.mrf.mxu1 }
 0x2f1   :  { %v804_v9 = vrot.slane %v796_v2, 7 }
 0x2f2   :  { %v711_v10 = vpop.f32.mrf.mxu0  ;;  %v899_v11 = vpop.f32.mrf.mxu1 }
 0x2f3   :  { %v805_v3 = vsel %vm583_vm0, %v804_v9, %v708_v7 }
 0x2f4   :  { %v880_v12 = vpop.f32.mrf.mxu0  ;;  %v799_v13 = vpop.f32.mrf.mxu1  ;;  %808 = vst.msk [vmem:[#allocation4] sm:$0x3] %vm807_vm4, %v805_v3 }
 0x2f5   :  { %1000 = shalt.err (!%p997_p4)
}
 0x2f6   :  { %818 = dma.vmem_to_hbm [thread:$0]  %s816_s9, 32, %s1483_s5, [#allocation5]   ;;  %v900_v14 = vpop.f32.mrf.mxu1 }
 0x2f7   :  { %1009 = dma.done.wait [#allocation5], 32  }
 0x2f8   :  { %1010 = vsyncadd [#allocation5], 4294967264 }
 0x2f9   :  { %822 = vsyncpa [#allocation5], 1 }

</bundles_post_ra>
